<compile_context>
chip_gen: v7x
topology: tpu7x:2x2x1
jax: 0.10.0
libtpu: 0.0.40
codegen_flags: <defaults>
</compile_context>

<pallas_src>
import functools
import math

import jax
import jax.numpy as jnp
from jax import lax
from jax.experimental import pallas as pl
from jax.experimental.pallas import tpu as pltpu


# -----------------------------------------------------------------------------
# Model configuration (small, deterministic)
# -----------------------------------------------------------------------------
BATCH = 8
INPUT_DIM = 16
HIDDEN_DIMS = (32, 32)
NUM_BLOCKS = 3
S_CLAMP_MIN = 1e-5
LOG_S_CLAMP_MIN = math.log(S_CLAMP_MIN)

D_HID = 128   # activation slab width = one vreg lane span
D_FIN = 256   # final fused layer width: mean -> lanes [0,128), scale -> [128,256)


# -----------------------------------------------------------------------------
# MADE mask construction (standard Germain et al. degree scheme, sample=False)
# -----------------------------------------------------------------------------
def made_masks(input_dim, hidden_dims, order):
    """order: int array in 1..input_dim giving the autoregressive ordering."""
    degrees = [jnp.asarray(order, jnp.int32)]
    for h in hidden_dims:
        degrees.append((jnp.arange(h, dtype=jnp.int32) % max(1, input_dim - 1)) + 1)
    masks = []
    for l in range(len(hidden_dims)):
        # hidden unit j may depend on previous unit i iff deg_prev[i] <= deg[j]
        masks.append((degrees[l][:, None] <= degrees[l + 1][None, :]).astype(jnp.float32))
    # output j may depend on last-hidden i iff deg_hidden[i] < order[j] (strict)
    masks.append((degrees[-1][:, None] < degrees[0][None, :]).astype(jnp.float32))
    return masks


def init_iaf_params(key, input_dim, hidden_dims, num_blocks):
    """Returns stacked (over blocks) masked weights / biases for mean & scale MADEs."""
    dims = [input_dim] + list(hidden_dims) + [input_dim]
    num_layers = len(dims) - 1

    mean_w = [[] for _ in range(num_layers)]
    mean_b = [[] for _ in range(num_layers)]
    scale_w = [[] for _ in range(num_layers)]
    scale_b = [[] for _ in range(num_layers)]

    for blk in range(num_blocks):
        reverse = (blk % 2 == 0)
        order = (jnp.arange(input_dim, 0, -1) if reverse
                 else jnp.arange(1, input_dim + 1))
        masks = made_masks(input_dim, hidden_dims, order)
        for net_w, net_b in ((mean_w, mean_b), (scale_w, scale_b)):
            for l in range(num_layers):
                key, kw, kb = jax.random.split(key, 3)
                w = 0.1 * jax.random.normal(kw, (dims[l], dims[l + 1]), jnp.float32)
                b = 0.01 * jax.random.normal(kb, (dims[l + 1],), jnp.float32)
                net_w[l].append(w * masks[l])          # pre-apply MADE mask
                net_b[l].append(b.reshape(1, dims[l + 1]))

    stack = lambda xs: jnp.stack(xs, axis=0)  # -> (num_blocks, ...)
    params = {
        "mean_w": [stack(mean_w[l]) for l in range(num_layers)],
        "mean_b": [stack(mean_b[l]) for l in range(num_layers)],
        "scale_w": [stack(scale_w[l]) for l in range(num_layers)],
        "scale_b": [stack(scale_b[l]) for l in range(num_layers)],
    }
    return params, num_layers


# -----------------------------------------------------------------------------
# Fuse mean + scale MADEs, pad to lane-aligned slabs, pack per layer-kind
# -----------------------------------------------------------------------------
def pack_fused_params(params, num_blocks, num_layers, input_dim, hidden_dims,
                      d_hid=D_HID, d_fin=D_FIN):
    """Fused layer layout inside the (tb, d_hid) activation slab:
         layer 0   : x in rows [0, input_dim); Wm -> cols [0, h0), Ws -> cols [h0, 2*h0)
         layer l>0 : mean rows [0, d_l) -> cols [0, d_{l+1}),
                     scale rows [d_l, 2*d_l) -> cols [d_{l+1}, 2*d_{l+1})
         final     : (d_hid, d_fin) with mean -> cols [0, input_dim),
                     scale -> cols [d_hid, d_hid + input_dim)
       Zero padding is exact (adds only zero terms / zero biases)."""
    dims = [input_dim] + list(hidden_dims) + [input_dim]
    assert len(hidden_dims) >= 1
    assert input_dim + 1 <= d_hid and 2 * max(dims[1:-1]) <= d_hid
    assert input_dim <= d_fin - d_hid

    w_hid, b_hid, w_fin, b_fin = [], [], [], []
    for blk in range(num_blocks):
        for l in range(num_layers):
            wm = params["mean_w"][l][blk]   # (din, dout)
            ws = params["scale_w"][l][blk]
            bm = params["mean_b"][l][blk]   # (1, dout)
            bs = params["scale_b"][l][blk]
            din, dout = wm.shape
            is_final = (l == num_layers - 1)
            out_w = d_fin if is_final else d_hid
            s_col = d_hid if is_final else dout   # scale-output column offset

            w = jnp.zeros((d_hid, out_w), jnp.float32)
            b = jnp.zeros((1, out_w), jnp.float32)
            w = w.at[:din, :dout].set(wm)
            if l == 0:
                w = w.at[:din, s_col:s_col + dout].set(ws)      # both paths read x
            else:
                w = w.at[din:2 * din, s_col:s_col + dout].set(ws)
            b = b.at[:, :dout].set(bm)
            b = b.at[:, s_col:s_col + dout].set(bs)

            if is_final:
                w_fin.append(w); b_fin.append(b)
            else:
                w_hid.append(w); b_hid.append(b)

    return (jnp.stack(w_hid, axis=0),   # (num_blocks*(num_layers-1), d_hid, d_hid)
            jnp.stack(b_hid, axis=0),   # (num_blocks*(num_layers-1), 1, d_hid)
            jnp.stack(w_fin, axis=0),   # (num_blocks, d_hid, d_fin)
            jnp.stack(b_fin, axis=0))   # (num_blocks, 1, d_fin)


# -----------------------------------------------------------------------------
# Pallas kernel: full IAF forward (all blocks) in one invocation
# -----------------------------------------------------------------------------
def make_iaf_kernel(num_blocks, num_hidden_layers, input_dim, d_hid):
    def kernel(x_ref, wh_ref, bh_ref, wf_ref, bf_ref, out_ref):
        # (tb, d_hid) lane-dense slab; x in lanes [0, input_dim), zeros elsewhere.
        x = x_ref[...].astype(jnp.float32)
        tb = x.shape[0]
        log_det = jnp.zeros((tb, 1), jnp.float32)

        for blk in range(num_blocks):                       # unrolled (tiny)
            h = x
            for l in range(num_hidden_layers):              # unrolled (tiny)
                idx = blk * num_hidden_layers + l
                h = jnp.dot(h, wh_ref[idx],
                            preferred_element_type=jnp.float32) + bh_ref[idx]
                h = jnp.maximum(h, 0.0)                     # ReLU on hidden
            hf = jnp.dot(h, wf_ref[blk],
                         preferred_element_type=jnp.float32) + bf_ref[blk]

            m = hf[:, :d_hid]            # vreg-boundary slice: mean (zeros beyond dim)
            u = hf[:, d_hid:]            # vreg-boundary slice: scale pre-act
            # log(max(exp(u), smin)) == max(u, log(smin))  (exp monotone)
            log_s = jnp.maximum(u, LOG_S_CLAMP_MIN)         # padded lanes -> 0 exactly
            s = jnp.exp(log_s)                              # padded lanes -> 1
            x = x * s + m                                   # padded lanes stay 0
            log_det = log_det + jnp.sum(log_s, axis=-1, keepdims=True)

        # write [ z | log_det | zeros ] with a lane-iota select -> one unmasked
        # 128-lane store (lane input_dim of x is a padded zero, safe to overwrite)
        lane = lax.broadcasted_iota(jnp.int32, (tb, d_hid), 1)
        out_ref[...] = jnp.where(lane == input_dim, log_det, x)

    return kernel


def iaf_forward(x, w_hid, b_hid, w_fin, b_fin, *, num_blocks, num_layers,
                input_dim, d_hid=D_HID, batch_tile=None):
    batch = x.shape[0]
    tb = batch if batch_tile is None else min(batch_tile, batch)
    assert batch % tb == 0
    # f32 sublane alignment: tile must be a multiple of 8 or the full extent
    assert tb % 8 == 0 or tb == batch
    grid = (batch // tb,)

    # lane-dense input slab: x in lanes [0, input_dim), zeros elsewhere
    x_slab = jnp.pad(x.astype(jnp.float32), ((0, 0), (0, d_hid - input_dim)))

    num_hidden_layers = num_layers - 1
    kernel = make_iaf_kernel(num_blocks, num_hidden_layers, input_dim, d_hid)

    out = pl.pallas_call(
        kernel,
        grid=grid,
        in_specs=[
            pl.BlockSpec((tb, d_hid), lambda i: (i, 0)),
            # whole-array, constant index_map -> weights stay VMEM-resident
            # across grid steps (no re-DMA when the block index doesn't change)
            pl.BlockSpec(w_hid.shape, lambda i: (0, 0, 0)),
            pl.BlockSpec(b_hid.shape, lambda i: (0, 0, 0)),
            pl.BlockSpec(w_fin.shape, lambda i: (0, 0, 0)),
            pl.BlockSpec(b_fin.shape, lambda i: (0, 0, 0)),
        ],
        out_specs=pl.BlockSpec((tb, d_hid), lambda i: (i, 0)),
        out_shape=jax.ShapeDtypeStruct((batch, d_hid), jnp.float32),
        # "parallel" only matters once grid > 1 (>=2 batch tiles); harmless here.
        compiler_params=pltpu.CompilerParams(
            dimension_semantics=("parallel",)),
    )(x_slab, w_hid, b_hid, w_fin, b_fin)

    z = out[:, :input_dim]
    log_det = out[:, input_dim]
    return z, log_det


# -----------------------------------------------------------------------------
# Pure-JAX reference (mirrors the PyTorch module, unfused params)
# -----------------------------------------------------------------------------
def iaf_reference(x, params, num_blocks, num_layers):
    def made(ws, bs, blk, xin):
        h = xin
        for l in range(num_layers):
            h = h @ ws[l][blk] + bs[l][blk]
            if l < num_layers - 1:
                h = jax.nn.relu(h)
        return h

    log_det = jnp.zeros_like(x)
    for blk in range(num_blocks):
        m = made(params["mean_w"], params["mean_b"], blk, x)
        s = jnp.maximum(jnp.exp(made(params["scale_w"], params["scale_b"], blk, x)),
                        S_CLAMP_MIN)
        x = x * s + m
        log_det = log_det + jnp.log(s)
    return x, log_det.sum(-1)


# -----------------------------------------------------------------------------
if __name__ == "__main__":
    key = jax.random.PRNGKey(0)
    key, kx, kp = jax.random.split(key, 3)

    x = jax.random.normal(kx, (BATCH, INPUT_DIM), jnp.float32)
    params, num_layers = init_iaf_params(kp, INPUT_DIM, HIDDEN_DIMS, NUM_BLOCKS)
    w_hid, b_hid, w_fin, b_fin = pack_fused_params(
        params, NUM_BLOCKS, num_layers, INPUT_DIM, HIDDEN_DIMS)

    run = jax.jit(functools.partial(
        iaf_forward, num_blocks=NUM_BLOCKS, num_layers=num_layers,
        input_dim=INPUT_DIM))
    z, log_det = run(x, w_hid, b_hid, w_fin, b_fin)
    jax.block_until_ready((z, log_det))

    z_ref, ld_ref = iaf_reference(x, params, NUM_BLOCKS, num_layers)
    assert jnp.allclose(z, z_ref, atol=1e-4, rtol=1e-4)
    assert jnp.allclose(log_det, ld_ref, atol=1e-4, rtol=1e-4)

    print("KERNEL_OK")
</pallas_src>

<mosaic_0001>
module attributes {stable_mosaic.version = 11 : i64} {
  func.func @kernel(%arg0: i32, %arg1: memref<8x128xf32, #tpu.memory_space<vmem>>, %arg2: memref<6x128x128xf32, #tpu.memory_space<vmem>>, %arg3: memref<6x1x128xf32, #tpu.memory_space<vmem>>, %arg4: memref<3x128x256xf32, #tpu.memory_space<vmem>>, %arg5: memref<3x1x256xf32, #tpu.memory_space<vmem>>, %arg6: memref<8x128xf32, #tpu.memory_space<vmem>>) attributes {dimension_semantics = [#tpu.dimension_semantics<parallel>], iteration_bounds = array<i64: 1>, scalar_prefetch = 0 : i64, scratch_operands = 0 : i64, tpu.core_type = #tpu.core_type<tc>, window_params = [{transform_indices = @transform_0, window_bounds = array<i64: 8, 128>}, {pipeline_mode = #tpu.pipeline_mode<synchronous>, transform_indices = @transform_1, window_bounds = array<i64: 6, 128, 128>}, {pipeline_mode = #tpu.pipeline_mode<synchronous>, transform_indices = @transform_2, window_bounds = array<i64: 6, 1, 128>}, {pipeline_mode = #tpu.pipeline_mode<synchronous>, transform_indices = @transform_3, window_bounds = array<i64: 3, 128, 256>}, {pipeline_mode = #tpu.pipeline_mode<synchronous>, transform_indices = @transform_4, window_bounds = array<i64: 3, 1, 256>}, {transform_indices = @transform_5, window_bounds = array<i64: 8, 128>}]} {
    %c0 = arith.constant 0 : index
    %c0_0 = arith.constant 0 : index
    %0 = vector.load %arg1[%c0, %c0_0] : memref<8x128xf32, #tpu.memory_space<vmem>>, vector<8x128xf32>
    %cst = arith.constant 0.000000e+00 : f32
    %1 = vector.broadcast %cst : f32 to vector<8x1xf32>
    %c0_1 = arith.constant 0 : index
    %c0_2 = arith.constant 0 : index
    %c0_3 = arith.constant 0 : index
    %2 = vector.load %arg2[%c0_1, %c0_2, %c0_3] : memref<6x128x128xf32, #tpu.memory_space<vmem>>, vector<1x128x128xf32>
    %3 = vector.shape_cast %2 : vector<1x128x128xf32> to vector<128x128xf32>
    %cst_4 = arith.constant dense<0.000000e+00> : vector<8x128xf32>
    %4 = tpu.matmul %0, %3, %cst_4 {dimension_numbers = #tpu.dot_dimension_numbers<[1], [0], [0], [1], [0, 0, 1, 1], [], []>} : vector<8x128xf32>, vector<128x128xf32>, vector<8x128xf32> -> vector<8x128xf32>
    %c0_5 = arith.constant 0 : index
    %c0_6 = arith.constant 0 : index
    %c0_7 = arith.constant 0 : index
    %5 = vector.load %arg3[%c0_5, %c0_6, %c0_7] : memref<6x1x128xf32, #tpu.memory_space<vmem>>, vector<1x1x128xf32>
    %6 = vector.shape_cast %5 : vector<1x1x128xf32> to vector<1x128xf32>
    %7 = vector.broadcast %6 : vector<1x128xf32> to vector<8x128xf32>
    %8 = arith.addf %4, %7 : vector<8x128xf32>
    %cst_8 = arith.constant 0.000000e+00 : f32
    %9 = vector.broadcast %cst_8 : f32 to vector<8x128xf32>
    %10 = arith.maximumf %8, %9 : vector<8x128xf32>
    %c1 = arith.constant 1 : index
    %c0_9 = arith.constant 0 : index
    %c0_10 = arith.constant 0 : index
    %11 = vector.load %arg2[%c1, %c0_9, %c0_10] : memref<6x128x128xf32, #tpu.memory_space<vmem>>, vector<1x128x128xf32>
    %12 = vector.shape_cast %11 : vector<1x128x128xf32> to vector<128x128xf32>
    %cst_11 = arith.constant dense<0.000000e+00> : vector<8x128xf32>
    %13 = tpu.matmul %10, %12, %cst_11 {dimension_numbers = #tpu.dot_dimension_numbers<[1], [0], [0], [1], [0, 0, 1, 1], [], []>} : vector<8x128xf32>, vector<128x128xf32>, vector<8x128xf32> -> vector<8x128xf32>
    %c1_12 = arith.constant 1 : index
    %c0_13 = arith.constant 0 : index
    %c0_14 = arith.constant 0 : index
    %14 = vector.load %arg3[%c1_12, %c0_13, %c0_14] : memref<6x1x128xf32, #tpu.memory_space<vmem>>, vector<1x1x128xf32>
    %15 = vector.shape_cast %14 : vector<1x1x128xf32> to vector<1x128xf32>
    %16 = vector.broadcast %15 : vector<1x128xf32> to vector<8x128xf32>
    %17 = arith.addf %13, %16 : vector<8x128xf32>
    %cst_15 = arith.constant 0.000000e+00 : f32
    %18 = vector.broadcast %cst_15 : f32 to vector<8x128xf32>
    %19 = arith.maximumf %17, %18 : vector<8x128xf32>
    %c0_16 = arith.constant 0 : index
    %c0_17 = arith.constant 0 : index
    %c0_18 = arith.constant 0 : index
    %20 = vector.load %arg4[%c0_16, %c0_17, %c0_18] : memref<3x128x256xf32, #tpu.memory_space<vmem>>, vector<1x128x256xf32>
    %21 = vector.shape_cast %20 : vector<1x128x256xf32> to vector<128x256xf32>
    %cst_19 = arith.constant dense<0.000000e+00> : vector<8x256xf32>
    %22 = tpu.matmul %19, %21, %cst_19 {dimension_numbers = #tpu.dot_dimension_numbers<[1], [0], [0], [1], [0, 0, 1, 1], [], []>} : vector<8x128xf32>, vector<128x256xf32>, vector<8x256xf32> -> vector<8x256xf32>
    %c0_20 = arith.constant 0 : index
    %c0_21 = arith.constant 0 : index
    %c0_22 = arith.constant 0 : index
    %23 = vector.load %arg5[%c0_20, %c0_21, %c0_22] : memref<3x1x256xf32, #tpu.memory_space<vmem>>, vector<1x1x256xf32>
    %24 = vector.shape_cast %23 : vector<1x1x256xf32> to vector<1x256xf32>
    %25 = vector.broadcast %24 : vector<1x256xf32> to vector<8x256xf32>
    %26 = arith.addf %22, %25 : vector<8x256xf32>
    %27 = vector.extract_strided_slice %26 {offsets = [0, 0], sizes = [8, 128], strides = [1, 1]} : vector<8x256xf32> to vector<8x128xf32>
    %28 = vector.extract_strided_slice %26 {offsets = [0, 128], sizes = [8, 128], strides = [1, 1]} : vector<8x256xf32> to vector<8x128xf32>
    %cst_23 = arith.constant -11.5129251 : f32
    %29 = vector.broadcast %cst_23 : f32 to vector<8x128xf32>
    %30 = arith.maximumf %28, %29 : vector<8x128xf32>
    %31 = math.exp %30 : vector<8x128xf32>
    %32 = arith.mulf %0, %31 : vector<8x128xf32>
    %33 = arith.addf %32, %27 : vector<8x128xf32>
    %cst_24 = arith.constant dense<0.000000e+00> : vector<8xf32>
    %34 = vector.multi_reduction <add>, %30, %cst_24 [1] : vector<8x128xf32> to vector<8xf32>
    %35 = vector.shape_cast %34 : vector<8xf32> to vector<8x1xf32>
    %36 = arith.addf %1, %35 : vector<8x1xf32>
    %c2 = arith.constant 2 : index
    %c0_25 = arith.constant 0 : index
    %c0_26 = arith.constant 0 : index
    %37 = vector.load %arg2[%c2, %c0_25, %c0_26] : memref<6x128x128xf32, #tpu.memory_space<vmem>>, vector<1x128x128xf32>
    %38 = vector.shape_cast %37 : vector<1x128x128xf32> to vector<128x128xf32>
    %cst_27 = arith.constant dense<0.000000e+00> : vector<8x128xf32>
    %39 = tpu.matmul %33, %38, %cst_27 {dimension_numbers = #tpu.dot_dimension_numbers<[1], [0], [0], [1], [0, 0, 1, 1], [], []>} : vector<8x128xf32>, vector<128x128xf32>, vector<8x128xf32> -> vector<8x128xf32>
    %c2_28 = arith.constant 2 : index
    %c0_29 = arith.constant 0 : index
    %c0_30 = arith.constant 0 : index
    %40 = vector.load %arg3[%c2_28, %c0_29, %c0_30] : memref<6x1x128xf32, #tpu.memory_space<vmem>>, vector<1x1x128xf32>
    %41 = vector.shape_cast %40 : vector<1x1x128xf32> to vector<1x128xf32>
    %42 = vector.broadcast %41 : vector<1x128xf32> to vector<8x128xf32>
    %43 = arith.addf %39, %42 : vector<8x128xf32>
    %cst_31 = arith.constant 0.000000e+00 : f32
    %44 = vector.broadcast %cst_31 : f32 to vector<8x128xf32>
    %45 = arith.maximumf %43, %44 : vector<8x128xf32>
    %c3 = arith.constant 3 : index
    %c0_32 = arith.constant 0 : index
    %c0_33 = arith.constant 0 : index
    %46 = vector.load %arg2[%c3, %c0_32, %c0_33] : memref<6x128x128xf32, #tpu.memory_space<vmem>>, vector<1x128x128xf32>
    %47 = vector.shape_cast %46 : vector<1x128x128xf32> to vector<128x128xf32>
    %cst_34 = arith.constant dense<0.000000e+00> : vector<8x128xf32>
    %48 = tpu.matmul %45, %47, %cst_34 {dimension_numbers = #tpu.dot_dimension_numbers<[1], [0], [0], [1], [0, 0, 1, 1], [], []>} : vector<8x128xf32>, vector<128x128xf32>, vector<8x128xf32> -> vector<8x128xf32>
    %c3_35 = arith.constant 3 : index
    %c0_36 = arith.constant 0 : index
    %c0_37 = arith.constant 0 : index
    %49 = vector.load %arg3[%c3_35, %c0_36, %c0_37] : memref<6x1x128xf32, #tpu.memory_space<vmem>>, vector<1x1x128xf32>
    %50 = vector.shape_cast %49 : vector<1x1x128xf32> to vector<1x128xf32>
    %51 = vector.broadcast %50 : vector<1x128xf32> to vector<8x128xf32>
    %52 = arith.addf %48, %51 : vector<8x128xf32>
    %cst_38 = arith.constant 0.000000e+00 : f32
    %53 = vector.broadcast %cst_38 : f32 to vector<8x128xf32>
    %54 = arith.maximumf %52, %53 : vector<8x128xf32>
    %c1_39 = arith.constant 1 : index
    %c0_40 = arith.constant 0 : index
    %c0_41 = arith.constant 0 : index
    %55 = vector.load %arg4[%c1_39, %c0_40, %c0_41] : memref<3x128x256xf32, #tpu.memory_space<vmem>>, vector<1x128x256xf32>
    %56 = vector.shape_cast %55 : vector<1x128x256xf32> to vector<128x256xf32>
    %cst_42 = arith.constant dense<0.000000e+00> : vector<8x256xf32>
    %57 = tpu.matmul %54, %56, %cst_42 {dimension_numbers = #tpu.dot_dimension_numbers<[1], [0], [0], [1], [0, 0, 1, 1], [], []>} : vector<8x128xf32>, vector<128x256xf32>, vector<8x256xf32> -> vector<8x256xf32>
    %c1_43 = arith.constant 1 : index
    %c0_44 = arith.constant 0 : index
    %c0_45 = arith.constant 0 : index
    %58 = vector.load %arg5[%c1_43, %c0_44, %c0_45] : memref<3x1x256xf32, #tpu.memory_space<vmem>>, vector<1x1x256xf32>
    %59 = vector.shape_cast %58 : vector<1x1x256xf32> to vector<1x256xf32>
    %60 = vector.broadcast %59 : vector<1x256xf32> to vector<8x256xf32>
    %61 = arith.addf %57, %60 : vector<8x256xf32>
    %62 = vector.extract_strided_slice %61 {offsets = [0, 0], sizes = [8, 128], strides = [1, 1]} : vector<8x256xf32> to vector<8x128xf32>
    %63 = vector.extract_strided_slice %61 {offsets = [0, 128], sizes = [8, 128], strides = [1, 1]} : vector<8x256xf32> to vector<8x128xf32>
    %cst_46 = arith.constant -11.5129251 : f32
    %64 = vector.broadcast %cst_46 : f32 to vector<8x128xf32>
    %65 = arith.maximumf %63, %64 : vector<8x128xf32>
    %66 = math.exp %65 : vector<8x128xf32>
    %67 = arith.mulf %33, %66 : vector<8x128xf32>
    %68 = arith.addf %67, %62 : vector<8x128xf32>
    %cst_47 = arith.constant dense<0.000000e+00> : vector<8xf32>
    %69 = vector.multi_reduction <add>, %65, %cst_47 [1] : vector<8x128xf32> to vector<8xf32>
    %70 = vector.shape_cast %69 : vector<8xf32> to vector<8x1xf32>
    %71 = arith.addf %36, %70 : vector<8x1xf32>
    %c4 = arith.constant 4 : index
    %c0_48 = arith.constant 0 : index
    %c0_49 = arith.constant 0 : index
    %72 = vector.load %arg2[%c4, %c0_48, %c0_49] : memref<6x128x128xf32, #tpu.memory_space<vmem>>, vector<1x128x128xf32>
    %73 = vector.shape_cast %72 : vector<1x128x128xf32> to vector<128x128xf32>
    %cst_50 = arith.constant dense<0.000000e+00> : vector<8x128xf32>
    %74 = tpu.matmul %68, %73, %cst_50 {dimension_numbers = #tpu.dot_dimension_numbers<[1], [0], [0], [1], [0, 0, 1, 1], [], []>} : vector<8x128xf32>, vector<128x128xf32>, vector<8x128xf32> -> vector<8x128xf32>
    %c4_51 = arith.constant 4 : index
    %c0_52 = arith.constant 0 : index
    %c0_53 = arith.constant 0 : index
    %75 = vector.load %arg3[%c4_51, %c0_52, %c0_53] : memref<6x1x128xf32, #tpu.memory_space<vmem>>, vector<1x1x128xf32>
    %76 = vector.shape_cast %75 : vector<1x1x128xf32> to vector<1x128xf32>
    %77 = vector.broadcast %76 : vector<1x128xf32> to vector<8x128xf32>
    %78 = arith.addf %74, %77 : vector<8x128xf32>
    %cst_54 = arith.constant 0.000000e+00 : f32
    %79 = vector.broadcast %cst_54 : f32 to vector<8x128xf32>
    %80 = arith.maximumf %78, %79 : vector<8x128xf32>
    %c5 = arith.constant 5 : index
    %c0_55 = arith.constant 0 : index
    %c0_56 = arith.constant 0 : index
    %81 = vector.load %arg2[%c5, %c0_55, %c0_56] : memref<6x128x128xf32, #tpu.memory_space<vmem>>, vector<1x128x128xf32>
    %82 = vector.shape_cast %81 : vector<1x128x128xf32> to vector<128x128xf32>
    %cst_57 = arith.constant dense<0.000000e+00> : vector<8x128xf32>
    %83 = tpu.matmul %80, %82, %cst_57 {dimension_numbers = #tpu.dot_dimension_numbers<[1], [0], [0], [1], [0, 0, 1, 1], [], []>} : vector<8x128xf32>, vector<128x128xf32>, vector<8x128xf32> -> vector<8x128xf32>
    %c5_58 = arith.constant 5 : index
    %c0_59 = arith.constant 0 : index
    %c0_60 = arith.constant 0 : index
    %84 = vector.load %arg3[%c5_58, %c0_59, %c0_60] : memref<6x1x128xf32, #tpu.memory_space<vmem>>, vector<1x1x128xf32>
    %85 = vector.shape_cast %84 : vector<1x1x128xf32> to vector<1x128xf32>
    %86 = vector.broadcast %85 : vector<1x128xf32> to vector<8x128xf32>
    %87 = arith.addf %83, %86 : vector<8x128xf32>
    %cst_61 = arith.constant 0.000000e+00 : f32
    %88 = vector.broadcast %cst_61 : f32 to vector<8x128xf32>
    %89 = arith.maximumf %87, %88 : vector<8x128xf32>
    %c2_62 = arith.constant 2 : index
    %c0_63 = arith.constant 0 : index
    %c0_64 = arith.constant 0 : index
    %90 = vector.load %arg4[%c2_62, %c0_63, %c0_64] : memref<3x128x256xf32, #tpu.memory_space<vmem>>, vector<1x128x256xf32>
    %91 = vector.shape_cast %90 : vector<1x128x256xf32> to vector<128x256xf32>
    %cst_65 = arith.constant dense<0.000000e+00> : vector<8x256xf32>
    %92 = tpu.matmul %89, %91, %cst_65 {dimension_numbers = #tpu.dot_dimension_numbers<[1], [0], [0], [1], [0, 0, 1, 1], [], []>} : vector<8x128xf32>, vector<128x256xf32>, vector<8x256xf32> -> vector<8x256xf32>
    %c2_66 = arith.constant 2 : index
    %c0_67 = arith.constant 0 : index
    %c0_68 = arith.constant 0 : index
    %93 = vector.load %arg5[%c2_66, %c0_67, %c0_68] : memref<3x1x256xf32, #tpu.memory_space<vmem>>, vector<1x1x256xf32>
    %94 = vector.shape_cast %93 : vector<1x1x256xf32> to vector<1x256xf32>
    %95 = vector.broadcast %94 : vector<1x256xf32> to vector<8x256xf32>
    %96 = arith.addf %92, %95 : vector<8x256xf32>
    %97 = vector.extract_strided_slice %96 {offsets = [0, 0], sizes = [8, 128], strides = [1, 1]} : vector<8x256xf32> to vector<8x128xf32>
    %98 = vector.extract_strided_slice %96 {offsets = [0, 128], sizes = [8, 128], strides = [1, 1]} : vector<8x256xf32> to vector<8x128xf32>
    %cst_69 = arith.constant -11.5129251 : f32
    %99 = vector.broadcast %cst_69 : f32 to vector<8x128xf32>
    %100 = arith.maximumf %98, %99 : vector<8x128xf32>
    %101 = math.exp %100 : vector<8x128xf32>
    %102 = arith.mulf %68, %101 : vector<8x128xf32>
    %103 = arith.addf %102, %97 : vector<8x128xf32>
    %cst_70 = arith.constant dense<0.000000e+00> : vector<8xf32>
    %104 = vector.multi_reduction <add>, %100, %cst_70 [1] : vector<8x128xf32> to vector<8xf32>
    %105 = vector.shape_cast %104 : vector<8xf32> to vector<8x1xf32>
    %106 = arith.addf %71, %105 : vector<8x1xf32>
    %107 = tpu.iota {dimensions = array<i32: 1>} : vector<8x128xi32>
    %c16_i32 = arith.constant 16 : i32
    %108 = vector.broadcast %c16_i32 : i32 to vector<8x128xi32>
    %109 = arith.cmpi eq, %107, %108 : vector<8x128xi32>
    %110 = vector.shape_cast %106 : vector<8x1xf32> to vector<8x1xf32>
    %111 = vector.broadcast %110 : vector<8x1xf32> to vector<8x128xf32>
    %112 = arith.select %109, %111, %103 : vector<8x128xi1>, vector<8x128xf32>
    %c0_71 = arith.constant 0 : index
    %c0_72 = arith.constant 0 : index
    %113 = vector.load %arg6[%c0_71, %c0_72] : memref<8x128xf32, #tpu.memory_space<vmem>>, vector<8x128xf32>
    tpu.vector_store %arg6[%c0_71, %c0_72], %112 {strides = array<i32>} : memref<8x128xf32, #tpu.memory_space<vmem>>, vector<8x128xf32>,
    return
  }
  func.func @transform_0(%arg0: i32) -> (i32, i32) {
    %c0_i32 = arith.constant 0 : i32
    %c0_i32_0 = arith.constant 0 : i32
    return %arg0, %c0_i32 : i32, i32
  }
  func.func @transform_1(%arg0: i32) -> (i32, i32, i32) {
    %c0_i32 = arith.constant 0 : i32
    %c0_i32_0 = arith.constant 0 : i32
    %c0_i32_1 = arith.constant 0 : i32
    %c0_i32_2 = arith.constant 0 : i32
    return %c0_i32, %c0_i32_0, %c0_i32_1 : i32, i32, i32
  }
  func.func @transform_2(%arg0: i32) -> (i32, i32, i32) {
    %c0_i32 = arith.constant 0 : i32
    %c0_i32_0 = arith.constant 0 : i32
    %c0_i32_1 = arith.constant 0 : i32
    %c0_i32_2 = arith.constant 0 : i32
    return %c0_i32, %c0_i32_0, %c0_i32_1 : i32, i32, i32
  }
  func.func @transform_3(%arg0: i32) -> (i32, i32, i32) {
    %c0_i32 = arith.constant 0 : i32
    %c0_i32_0 = arith.constant 0 : i32
    %c0_i32_1 = arith.constant 0 : i32
    %c0_i32_2 = arith.constant 0 : i32
    return %c0_i32, %c0_i32_0, %c0_i32_1 : i32, i32, i32
  }
  func.func @transform_4(%arg0: i32) -> (i32, i32, i32) {
    %c0_i32 = arith.constant 0 : i32
    %c0_i32_0 = arith.constant 0 : i32
    %c0_i32_1 = arith.constant 0 : i32
    %c0_i32_2 = arith.constant 0 : i32
    return %c0_i32, %c0_i32_0, %c0_i32_1 : i32, i32, i32
  }
  func.func @transform_5(%arg0: i32) -> (i32, i32) {
    %c0_i32 = arith.constant 0 : i32
    %c0_i32_0 = arith.constant 0 : i32
    return %arg0, %c0_i32 : i32, i32
  }
}

</mosaic_0001>

<bundles_post_ra>
// kernel: iaf_forward.1
= control target key start
LH: loop header
LB: loop body
LE: loop exit
PB: predicated region body
PF: predicated region fallthrough
CT: control target
= control target key end

     0   :  { %10 = vsyncpa [#allocation3], 0  ;;  %s1818_s0 = inlined_call_operand.vmem [shape: f32[8,128], index: 0, kind: input, shape index: {}]   ;;  %s1819_s1 = inlined_call_operand.hbm [shape: f32[6,128,128], index: 1, kind: input, shape index: {}]   ;;  %s1820_s2 = inlined_call_operand.vmem [shape: f32[6,1,128], index: 2, kind: input, shape index: {}]   ;;  %s1821_s3 = inlined_call_operand.hbm [shape: f32[3,128,256], index: 3, kind: input, shape index: {}]   ;;  %s1822_s4 = inlined_call_operand.vmem [shape: f32[3,1,256], index: 4, kind: input, shape index: {}]   ;;  %s1823_s5 = inlined_call_operand.vmem [shape: f32[8,128], index: 5, kind: output, shape index: {}]  }
   0x1   :  { %11 = vsyncpa [#allocation5], 0  ;;  %s1635_s18 = smov [#allocation2]   ;;  %s1587_s22 = scalar_lea.hbm %s1819_s1, 12288 }
   0x2   :  { %s19_s19 = sshll.u32 %s1635_s18, 4  ;;  %p1588_p0 = scmp.ne.s32.totalorder %s1819_s1, %s1587_s22  ;;  %s20_s19 = int_to_ptr.vmem [resolvable:$true] %s19_s19 }
   0x3   :  { %p1591_p1 = scmp.lt.u32.totalorder %s1587_s22, %s1819_s1 }
   0x5   :  { %p1593_p2 = pnand %p1591_p1, %p1588_p0 }
   0x7   :  { %1596 = shalt.err (!%p1593_p2)
}
   0x8   :  { %s1597_s27 = scalar_lea.vmem %s20_s19, 12288  ;;  %p1602_p4 = scmp.lt.s32.totalorder %s20_s19, %s20_s19 }
   0x9   :  { %p1598_p3 = scmp.ne.s32.totalorder %s20_s19, %s1597_s27  ;;  %p1603_p5 = scmp.lt.s32.totalorder %s1597_s27, %s1597_s27 }
   0xb   :  { %p1604_p6 = por %p1603_p5, %p1602_p4 }
   0xd   :  { %p1605_p7 = pnand %p1604_p6, %p1598_p3 }
   0xf   :  { %1608 = shalt.err (!%p1605_p7)
}
  0x10   :  { %s1636_s28 = smov 128   ;;  %s1637_s29 = smov 8  }
  0x11   :  { %25 = dma.hbm_to_vmem [thread:$0]  %s1819_s1, 12288, %s20_s19, [#allocation3], %s1636_s28, %s1636_s28, %s1637_s29  }
  0x12   :  { %s1638_s7 = smov [#allocation4]   ;;  %s1609_s11 = scalar_lea.hbm %s1821_s3, 12288 }
  0x13   :  { %s33_s8 = sshll.u32 %s1638_s7, 4  ;;  %p1610_p8 = scmp.ne.s32.totalorder %s1821_s3, %s1609_s11  ;;  %s34_s8 = int_to_ptr.vmem [resolvable:$true] %s33_s8 }
  0x14   :  { %p1613_p9 = scmp.lt.u32.totalorder %s1609_s11, %s1821_s3 }
  0x16   :  { %p1615_p10 = pnand %p1613_p9, %p1610_p8 }
  0x18   :  { %1618 = shalt.err (!%p1615_p10)
}
  0x19   :  { %s1619_s16 = scalar_lea.vmem %s34_s8, 12288  ;;  %p1624_p12 = scmp.lt.s32.totalorder %s34_s8, %s34_s8 }
  0x1a   :  { %p1620_p11 = scmp.ne.s32.totalorder %s34_s8, %s1619_s16  ;;  %p1625_p13 = scmp.lt.s32.totalorder %s1619_s16, %s1619_s16 }
  0x1c   :  { %p1626_p0 = por %p1625_p13, %p1624_p12 }
  0x1e   :  { %p1627_p1 = pnand %p1626_p0, %p1620_p11 }
  0x20   :  { %1630 = shalt.err (!%p1627_p1)
}
  0x21   :  { %s1639_s1 = smov 256   ;;  %s1640_s17 = smov 16  }
  0x22   :  { %39 = dma.hbm_to_vmem [thread:$0]  %s1821_s3, 12288, %s34_s8, [#allocation5], %s1639_s1, %s1639_s1, %s1640_s17  }
  0x23   :  { %1631 = dma.done.wait [#allocation3], 12288  }
  0x24   :  { %1632 = vsyncadd [#allocation3], 4294955008 }
  0x25   :  { %1633 = dma.done.wait [#allocation5], 12288  }
  0x26   :  { %1634 = vsyncadd [#allocation5], 4294955008  ;;  %v1641_v0 = vmov 0.0|0.0   ;;  %vm1642_vm0 = vmmov 0   ;;  %v1643_v1 = vmov 0.0   ;;  %v49_v2 = vld [vmem:[#allocation2] sm:$0xff] }
  0x27   :  { %1332 = vmatprep.subr.bf16.mxu0 %v1641_v0  ;;  %1154 = vmatprep.mubr.msk.f32.mxu0 %vm1642_vm0, %v1643_v1  ;;  %v50_v3 = vld [vmem:[#allocation2 + $0x8] sm:$0xff]  ;;  %v51_v4 = vld [vmem:[#allocation2 + $0x10] sm:$0xff]  ;;  %v52_v6 = vld [vmem:[#allocation2 + $0x18] sm:$0xff] }
  0x28   :  { %1356 = vmatprep.subr.bf16.mxu1 %v1641_v0  ;;  %1189 = vmatprep.mubr.msk.f32.mxu1 %vm1642_vm0, %v1643_v1  ;;  %v1333_v5 = vpack.c.bf16 %v50_v3, %v49_v2  ;;  %v1336_v7 = vpack.c.bf16 %v52_v6, %v51_v4  ;;  %v53_v8 = vld [vmem:[#allocation2 + $0x20] sm:$0xff]  ;;  %v54_v9 = vld [vmem:[#allocation2 + $0x28] sm:$0xff]  ;;  %v146_v12 = vld [vmem:[#allocation2 + $0x90] sm:$0xff] }
  0x29   :  { %v144_v10 = vld [vmem:[#allocation2 + $0x80] sm:$0xff]  ;;  %v145_v11 = vld [vmem:[#allocation2 + $0x88] sm:$0xff]  ;;  %v147_v13 = vld [vmem:[#allocation2 + $0x98] sm:$0xff]  ;;  %v1339_v14 = vpack.c.bf16 %v54_v9, %v53_v8 }
  0x2a   :  { %1334 = vmatpush3.bf16.msra.mxu0 %v1333_v5  ;;  %v1357_v15 = vpack.c.bf16 %v145_v11, %v144_v10  ;;  %v55_v16 = vld [vmem:[#allocation2 + $0x30] sm:$0xff]  ;;  %v56_v17 = vld [vmem:[#allocation2 + $0x38] sm:$0xff]  ;;  %v1360_v18 = vpack.c.bf16 %v147_v13, %v146_v12  ;;  %v148_v19 = vld [vmem:[#allocation2 + $0xa0] sm:$0xff] }
  0x2b   :  { %1335 = vmatprep.subr.bf16.mxu0 %v1641_v0  ;;  %v149_v20 = vld [vmem:[#allocation2 + $0xa8] sm:$0xff]  ;;  %v1342_v21 = vpack.c.bf16 %v56_v17, %v55_v16  ;;  %v57_v22 = vld [vmem:[#allocation2 + $0x40] sm:$0xff]  ;;  %v150_v25 = vld [vmem:[#allocation2 + $0xb0] sm:$0xff] }
  0x2c   :  { %1358 = vmatpush3.bf16.msra.mxu1 %v1357_v15  ;;  %v58_v23 = vld [vmem:[#allocation2 + $0x48] sm:$0xff]  ;;  %v1363_v24 = vpack.c.bf16 %v149_v20, %v148_v19  ;;  %v151_v26 = vld [vmem:[#allocation2 + $0xb8] sm:$0xff]  ;;  %v59_v28 = vld [vmem:[#allocation2 + $0x50] sm:$0xff] }
  0x2d   :  { %1359 = vmatprep.subr.bf16.mxu1 %v1641_v0  ;;  %v1345_v27 = vpack.c.bf16 %v58_v23, %v57_v22  ;;  %v60_v29 = vld [vmem:[#allocation2 + $0x58] sm:$0xff]  ;;  %v1366_v30 = vpack.c.bf16 %v151_v26, %v150_v25  ;;  %v152_v31 = vld [vmem:[#allocation2 + $0xc0] sm:$0xff]  ;;  %v153_v32 = vld [vmem:[#allocation2 + $0xc8] sm:$0xff] }
  0x2e   :  { %1337 = vmatpush3.bf16.msra.mxu0 %v1336_v7  ;;  %v1348_v33 = vpack.c.bf16 %v60_v29, %v59_v28  ;;  %v61_v34 = vld [vmem:[#allocation2 + $0x60] sm:$0xff]  ;;  %v62_v35 = vld [vmem:[#allocation2 + $0x68] sm:$0xff]  ;;  %v1369_v36 = vpack.c.bf16 %v153_v32, %v152_v31  ;;  %v154_v37 = vld [vmem:[#allocation2 + $0xd0] sm:$0xff] }
  0x2f   :  { %1338 = vmatprep.subr.bf16.mxu0 %v1641_v0  ;;  %v155_v38 = vld [vmem:[#allocation2 + $0xd8] sm:$0xff]  ;;  %v1351_v39 = vpack.c.bf16 %v62_v35, %v61_v34  ;;  %v63_v40 = vld [vmem:[#allocation2 + $0x70] sm:$0xff]  ;;  %v156_v43 = vld [vmem:[#allocation2 + $0xe0] sm:$0xff] }
  0x30   :  { %1361 = vmatpush3.bf16.msra.mxu1 %v1360_v18  ;;  %v64_v41 = vld [vmem:[#allocation2 + $0x78] sm:$0xff]  ;;  %v1372_v42 = vpack.c.bf16 %v155_v38, %v154_v37  ;;  %v157_v44 = vld [vmem:[#allocation2 + $0xe8] sm:$0xff]  ;;  %v158_v48 = vld [vmem:[#allocation2 + $0xf0] sm:$0xff] }
  0x31   :  { %1362 = vmatprep.subr.bf16.mxu1 %v1641_v0  ;;  %v1354_v45 = vpack.c.bf16 %v64_v41, %v63_v40  ;;  %v1375_v46 = vpack.c.bf16 %v157_v44, %v156_v43  ;;  %v1720_v47 = vld [vmem:[%s1818_s0] sm:$0xff]  ;;  %v240_v51 = vld [vmem:[#allocation4 + $0x8] sm:$0xff]  ;;  %v239_v53 = vld [vmem:[#allocation4] sm:$0xff] }
  0x32   :  { %1340 = vmatpush3.bf16.msra.mxu0 %v1339_v14  ;;  %v159_v49 = vld [vmem:[#allocation2 + $0xf8] sm:$0xff]  ;;  %v241_v55 = vld [vmem:[#allocation4 + $0x10] sm:$0xff]  ;;  %v244_v56 = vld [vmem:[#allocation4 + $0x28] sm:$0xff] }
  0x33   :  { %1341 = vmatprep.subr.bf16.mxu0 %v1641_v0  ;;  %v1378_v50 = vpack.c.bf16 %v159_v49, %v158_v48  ;;  %v242_v52 = vld [vmem:[#allocation4 + $0x18] sm:$0xff]  ;;  %v1382_v58 = vpack.c.bf16 %v241_v55, %v239_v53  ;;  %v243_v60 = vld [vmem:[#allocation4 + $0x20] sm:$0xff]  ;;  %v245_v61 = vld [vmem:[#allocation4 + $0x30] sm:$0xff] }
  0x34   :  { %1364 = vmatpush3.bf16.msra.mxu1 %v1363_v24  ;;  %v1380_v54 = vpack.c.bf16 %v242_v52, %v240_v51  ;;  %v246_v57 = vld [vmem:[#allocation4 + $0x38] sm:$0xff]  ;;  %v248_v62 = vld [vmem:[#allocation4 + $0x48] sm:$0xff]  ;;  %v1386_v2 = vpack.c.bf16 %v245_v61, %v243_v60  ;;  %v247_v4 = vld [vmem:[#allocation4 + $0x40] sm:$0xff] }
  0x35   :  { %1365 = vmatprep.subr.bf16.mxu1 %v1641_v0  ;;  %v1384_v59 = vpack.c.bf16 %v246_v57, %v244_v56  ;;  %v250_v63 = vld [vmem:[#allocation4 + $0x58] sm:$0xff]  ;;  %v249_v5 = vld [vmem:[#allocation4 + $0x50] sm:$0xff]  ;;  %v252_v6 = vld [vmem:[#allocation4 + $0x68] sm:$0xff] }
  0x36   :  { %1343 = vmatpush3.bf16.msra.mxu0 %v1342_v21  ;;  %v1388_v3 = vpack.c.bf16 %v250_v63, %v248_v62  ;;  %v254_v7 = vld [vmem:[#allocation4 + $0x78] sm:$0xff]  ;;  %v1390_v8 = vpack.c.bf16 %v249_v5, %v247_v4  ;;  %v251_v10 = vld [vmem:[#allocation4 + $0x60] sm:$0xff]  ;;  %v253_v11 = vld [vmem:[#allocation4 + $0x70] sm:$0xff] }
  0x37   :  { %1344 = vmatprep.subr.bf16.mxu0 %v1641_v0  ;;  %v1392_v9 = vpack.c.bf16 %v254_v7, %v252_v6  ;;  %v256_v12 = vld [vmem:[#allocation4 + $0x88] sm:$0xff]  ;;  %v258_v13 = vld [vmem:[#allocation4 + $0x98] sm:$0xff]  ;;  %v1394_v14 = vpack.c.bf16 %v253_v11, %v251_v10  ;;  %v255_v16 = vld [vmem:[#allocation4 + $0x80] sm:$0xff]  ;;  %v273_v10 = vlaneseq }
  0x38   :  { %1367 = vmatpush3.bf16.msra.mxu1 %v1366_v30  ;;  %v1396_v15 = vpack.c.bf16 %v258_v13, %v256_v12  ;;  %v257_v17 = vld [vmem:[#allocation4 + $0x90] sm:$0xff]  ;;  %v260_v18 = vld [vmem:[#allocation4 + $0xa8] sm:$0xff]  ;;  %v262_v19 = vld [vmem:[#allocation4 + $0xb8] sm:$0xff] }
  0x39   :  { %1368 = vmatprep.subr.bf16.mxu1 %v1641_v0  ;;  %v1398_v20 = vpack.c.bf16 %v257_v17, %v255_v16  ;;  %v1400_v21 = vpack.c.bf16 %v262_v19, %v260_v18  ;;  %v259_v22 = vld [vmem:[#allocation4 + $0xa0] sm:$0xff]  ;;  %v261_v23 = vld [vmem:[#allocation4 + $0xb0] sm:$0xff]  ;;  %v264_v24 = vld [vmem:[#allocation4 + $0xc8] sm:$0xff]  ;;  %v274_v11 = vshrl.u32 %v273_v10, 7 }
  0x3a   :  { %1346 = vmatpush3.bf16.msra.mxu0 %v1345_v27  ;;  %v266_v25 = vld [vmem:[#allocation4 + $0xd8] sm:$0xff]  ;;  %v1402_v26 = vpack.c.bf16 %v261_v23, %v259_v22  ;;  %v263_v28 = vld [vmem:[#allocation4 + $0xc0] sm:$0xff]  ;;  %v265_v29 = vld [vmem:[#allocation4 + $0xd0] sm:$0xff] }
  0x3b   :  { %1347 = vmatprep.subr.bf16.mxu0 %v1641_v0  ;;  %v1404_v27 = vpack.c.bf16 %v266_v25, %v264_v24  ;;  %v1406_v30 = vpack.c.bf16 %v265_v29, %v263_v28  ;;  %v1007_v31 = vld [vmem:[%s1820_s2] ss:$0 sm:$0xff]  ;;  %v269_v40 = vld [vmem:[#allocation4 + $0xf0] sm:$0xff]  ;;  %v364_v43 = vld [vmem:[#allocation2 + $0x108] sm:$0xff]  ;;  %v1745_v12 = vsub.s32 1, %v274_v11 }
  0x3c   :  { %1370 = vmatpush3.bf16.msra.mxu1 %v1369_v36  ;;  %v268_v36 = vld [vmem:[#allocation4 + $0xe8] sm:$0xff]  ;;  %v270_v37 = vld [vmem:[#allocation4 + $0xf8] sm:$0xff]  ;;  %v365_v44 = vld [vmem:[#allocation2 + $0x110] sm:$0xff] }
  0x3d   :  { %1371 = vmatprep.subr.bf16.mxu1 %v1641_v0  ;;  %v1408_v38 = vpack.c.bf16 %v270_v37, %v268_v36  ;;  %v1009_v49 = vld [vmem:[%s1820_s2 + $0x1] ss:$0 sm:$0xff]  ;;  %v368_v55 = vld [vmem:[#allocation2 + $0x128] sm:$0xff]  ;;  %v369_v57 = vld [vmem:[#allocation2 + $0x130] sm:$0xff] }
  0x3e   :  { %1349 = vmatpush3.bf16.msra.mxu0 %v1348_v33  ;;  %v371_v60 = vld [vmem:[#allocation2 + $0x140] sm:$0xff]  ;;  %v372_v61 = vld [vmem:[#allocation2 + $0x148] sm:$0xff]  ;;  %v373_v63 = vld [vmem:[#allocation2 + $0x150] sm:$0xff] }
  0x3f   :  { %1350 = vmatprep.subr.bf16.mxu0 %v1641_v0  ;;  %v1425_v62 = vpack.c.bf16 %v372_v61, %v371_v60  ;;  %v375_v4 = vld [vmem:[#allocation2 + $0x160] sm:$0xff]  ;;  %v376_v5 = vld [vmem:[#allocation2 + $0x168] sm:$0xff]  ;;  %v377_v7 = vld [vmem:[#allocation2 + $0x170] sm:$0xff] }
  0x40   :  { %1373 = vmatpush3.bf16.msra.mxu1 %v1372_v42  ;;  %v363_v42 = vld [vmem:[#allocation2 + $0x100] sm:$0xff]  ;;  %v1431_v6 = vpack.c.bf16 %v376_v5, %v375_v4  ;;  %v271_v13 = vld [vmem:[%s1822_s4] sm:$0x3]  ;;  %v561_v60 = vld [vmem:[#allocation4 + $0x130] sm:$0xff] }
  0x41   :  { %1374 = vmatprep.subr.bf16.mxu1 %v1641_v0  ;;  %v459_v25 = vld [vmem:[#allocation2 + $0x180] sm:$0xff]  ;;  %v462_v29 = vld [vmem:[#allocation2 + $0x198] sm:$0xff]  ;;  %v564_v61 = vld [vmem:[#allocation4 + $0x148] sm:$0xff] }
  0x42   :  { %1352 = vmatpush3.bf16.msra.mxu0 %v1351_v39  ;;  %v267_v39 = vld [vmem:[#allocation4 + $0xe0] sm:$0xff]  ;;  %v565_v4 = vld [vmem:[#allocation4 + $0x150] sm:$0xff]  ;;  %v568_v5 = vld [vmem:[#allocation4 + $0x168] sm:$0xff] }
  0x43   :  { %1353 = vmatprep.subr.bf16.mxu0 %v1641_v0  ;;  %v1410_v41 = vpack.c.bf16 %v269_v40, %v267_v39  ;;  %v467_v37 = vld [vmem:[#allocation2 + $0x1c0] sm:$0xff]  ;;  %v469_v40 = vld [vmem:[#allocation2 + $0x1d0] sm:$0xff] }
  0x44   :  { %1376 = vmatpush3.bf16.msra.mxu1 %v1375_v46  ;;  %v366_v46 = vld [vmem:[#allocation2 + $0x118] sm:$0xff] }
  0x45   :  { %1377 = vmatprep.subr.bf16.mxu1 %v1641_v0  ;;  %v1416_v48 = vpack.c.bf16 %v366_v46, %v365_v44  ;;  %v472_v44 = vld [vmem:[#allocation2 + $0x1e8] sm:$0xff]  ;;  %v473_v46 = vld [vmem:[#allocation2 + $0x1f0] sm:$0xff] }
  0x46   :  { %1355 = vmatpush3.bf16.msra.mxu0 %v1354_v45  ;;  %v1413_v45 = vpack.c.bf16 %v364_v43, %v363_v42  ;;  %v471_v43 = vld [vmem:[#allocation2 + $0x1e0] sm:$0xff] }
  0x47   :  { %1381 = vmatprep.subr.bf16.mxu0 %v1380_v54  ;;  %v367_v54 = vld [vmem:[#allocation2 + $0x120] sm:$0xff] }
  0x48   :  { %1379 = vmatpush3.bf16.msra.mxu1 %v1378_v50  ;;  %v1419_v56 = vpack.c.bf16 %v368_v55, %v367_v54  ;;  %v557_v54 = vld [vmem:[#allocation4 + $0x110] sm:$0xff]  ;;  %v560_v55 = vld [vmem:[#allocation4 + $0x128] sm:$0xff] }
  0x49   :  { %1155 = vmatmul.mubr.f32.vlgmr.msra.gmra.mrb[0].mxu0 %v1720_v47  ;;  %1412 = vmatprep.subr.bf16.mxu1 %v1641_v0 }
  0x4a   :  { %347 = vmatprep.mubr.f32.mxu0 %v1643_v1  ;;  %1383 = vmatpush1.bf16.msra.mxu0 %v1382_v58  ;;  %v370_v58 = vld [vmem:[#allocation2 + $0x138] sm:$0xff] }
  0x4b   :  { %1385 = vmatprep.subr.bf16.mxu0 %v1384_v59  ;;  %v1422_v59 = vpack.c.bf16 %v370_v58, %v369_v57 }
  0x4e   :  { %1387 = vmatpush1.bf16.msra.mxu0 %v1386_v2  ;;  %v374_v2 = vld [vmem:[#allocation2 + $0x158] sm:$0xff] }
  0x4f   :  { %1389 = vmatprep.subr.bf16.mxu0 %v1388_v3  ;;  %v1428_v3 = vpack.c.bf16 %v374_v2, %v373_v63 }
  0x52   :  { %1391 = vmatpush1.bf16.msra.mxu0 %v1390_v8  ;;  %v378_v8 = vld [vmem:[#allocation2 + $0x178] sm:$0xff] }
  0x53   :  { %1393 = vmatprep.subr.bf16.mxu0 %v1392_v9  ;;  %v1434_v9 = vpack.c.bf16 %v378_v8, %v377_v7 }
  0x56   :  { %1395 = vmatpush1.bf16.msra.mxu0 %v1394_v14  ;;  %v280_v14 = vrot.slane %v271_v13, %v1745_v12 }
  0x57   :  { %1397 = vmatprep.subr.bf16.mxu0 %v1396_v15 }
  0x5a   :  { %1399 = vmatpush1.bf16.msra.mxu0 %v1398_v20  ;;  %v1751_v20 = vsub.s32 0, %v274_v11  ;;  %v569_v11 = vld [vmem:[#allocation4 + $0x170] sm:$0xff] }
  0x5b   :  { %1401 = vmatprep.subr.bf16.mxu0 %v1400_v21 }
  0x5c   :  { %v276_v21 = vrot.slane %v271_v13, %v1751_v20  ;;  %v572_v13 = vld [vmem:[#allocation4 + $0x188] sm:$0xff] }
  0x5e   :  { %1403 = vmatpush1.bf16.msra.mxu0 %v1402_v26  ;;  %v460_v26 = vld [vmem:[#allocation2 + $0x188] sm:$0xff] }
  0x5f   :  { %1405 = vmatprep.subr.bf16.mxu0 %v1404_v27  ;;  %v461_v27 = vld [vmem:[#allocation2 + $0x190] sm:$0xff]  ;;  %v1437_v28 = vpack.c.bf16 %v460_v26, %v459_v25  ;;  %v580_v26 = vld [vmem:[#allocation4 + $0x1c8] sm:$0xff] }
  0x60   :  { %v577_v25 = vld [vmem:[#allocation4 + $0x1b0] sm:$0xff] }
  0x62   :  { %1407 = vmatpush1.bf16.msra.mxu0 %v1406_v30 }
  0x63   :  { %1409 = vmatprep.subr.bf16.mxu0 %v1408_v38  ;;  %v468_v38 = vld [vmem:[#allocation2 + $0x1c8] sm:$0xff] }
  0x64   :  { %v1449_v39 = vpack.c.bf16 %v468_v38, %v467_v37  ;;  %v584_v38 = vld [vmem:[#allocation4 + $0x1e8] sm:$0xff] }
  0x66   :  { %1411 = vmatpush1.bf16.msra.mxu0 %v1410_v41  ;;  %v470_v41 = vld [vmem:[#allocation2 + $0x1d8] sm:$0xff] }
  0x67   :  { %1436 = vmatprep.subr.bf16.mxu0 %v1641_v0  ;;  %v1452_v42 = vpack.c.bf16 %v470_v41, %v469_v40  ;;  %v583_v41 = vld [vmem:[#allocation4 + $0x1e0] sm:$0xff] }
 0x11c   :  { %v138_v32 = vpop.f32.mrb[0].mxu0 }
 0x11d   :  { %v139_v33 = vadd.f32 %v1007_v31, %v138_v32  ;;  %v1156_v34 = vpop.f32.mrb[1].mxu0  ;;  %v1440_v31 = vpack.c.bf16 %v462_v29, %v461_v27  ;;  %v463_v32 = vld [vmem:[#allocation2 + $0x1a0] sm:$0xff]  ;;  %v582_v27 = vld [vmem:[#allocation4 + $0x1d8] sm:$0xff] }
 0x11e   :  { %v1484_v29 = vpack.c.bf16 %v582_v27, %v580_v26  ;;  %v776_v26 = vld [vmem:[#allocation2 + $0x280] sm:$0xff]  ;;  %v777_v27 = vld [vmem:[#allocation2 + $0x288] sm:$0xff] }
 0x11f   :  { %v142_v35 = vmax.f32 %v139_v33, 0.0  ;;  %v464_v33 = vld [vmem:[#allocation2 + $0x1a8] sm:$0xff] }
 0x120   :  { %v1443_v34 = vpack.c.bf16 %v464_v33, %v463_v32  ;;  %v581_v32 = vld [vmem:[#allocation4 + $0x1d0] sm:$0xff] }
 0x121   :  { %1190 = vmatmul.mubr.f32.vlgmr.msra.gmra.mrb[0].mxu1 %v142_v35  ;;  %v466_v35 = vld [vmem:[#allocation2 + $0x1b8] sm:$0xff] }
 0x122   :  { %1224 = vmatprep.mubr.msk.f32.mxu1 %vm1642_vm0, %v1643_v1  ;;  %1414 = vmatpush3.bf16.msra.mxu1 %v1413_v45  ;;  %v1455_v45 = vpack.c.bf16 %v472_v44, %v471_v43  ;;  %v680_v44 = vld [vmem:[#allocation2 + $0x200] sm:$0xff] }
 0x123   :  { %1415 = vmatprep.subr.bf16.mxu1 %v1641_v0 }
 0x126   :  { %1417 = vmatpush3.bf16.msra.mxu1 %v1416_v48  ;;  %v474_v48 = vld [vmem:[#allocation2 + $0x1f8] sm:$0xff] }
 0x127   :  { %1418 = vmatprep.subr.bf16.mxu1 %v1641_v0 }
 0x12a   :  { %1420 = vmatpush3.bf16.msra.mxu1 %v1419_v56  ;;  %v562_v56 = vld [vmem:[#allocation4 + $0x138] sm:$0xff] }
 0x12b   :  { %1421 = vmatprep.subr.bf16.mxu1 %v1641_v0  ;;  %v1464_v58 = vpack.c.bf16 %v562_v56, %v560_v55  ;;  %v684_v56 = vld [vmem:[#allocation2 + $0x220] sm:$0xff] }
 0x12e   :  { %1423 = vmatpush3.bf16.msra.mxu1 %v1422_v59  ;;  %v559_v59 = vld [vmem:[#allocation4 + $0x120] sm:$0xff] }
 0x12f   :  { %1424 = vmatprep.subr.bf16.mxu1 %v1641_v0  ;;  %v1466_v63 = vpack.c.bf16 %v561_v60, %v559_v59  ;;  %v686_v59 = vld [vmem:[#allocation2 + $0x230] sm:$0xff]  ;;  %v687_v60 = vld [vmem:[#allocation2 + $0x238] sm:$0xff] }
 0x132   :  { %1426 = vmatpush3.bf16.msra.mxu1 %v1425_v62  ;;  %v566_v62 = vld [vmem:[#allocation4 + $0x158] sm:$0xff] }
 0x133   :  { %1427 = vmatprep.subr.bf16.mxu1 %v1641_v0  ;;  %v1468_v2 = vpack.c.bf16 %v566_v62, %v564_v61  ;;  %v1502_v61 = vpack.c.bf16 %v687_v60, %v686_v59  ;;  %v688_v62 = vld [vmem:[#allocation2 + $0x240] sm:$0xff]  ;;  %v878_v60 = vld [vmem:[#allocation4 + $0x230] sm:$0xff] }
 0x134   :  { %v876_v59 = vld [vmem:[#allocation4 + $0x220] sm:$0xff] }
 0x136   :  { %1429 = vmatpush3.bf16.msra.mxu1 %v1428_v3  ;;  %v563_v3 = vld [vmem:[#allocation4 + $0x140] sm:$0xff] }
 0x137   :  { %1430 = vmatprep.subr.bf16.mxu1 %v1641_v0  ;;  %v1470_v7 = vpack.c.bf16 %v565_v4, %v563_v3  ;;  %v690_v3 = vld [vmem:[#allocation2 + $0x250] sm:$0xff]  ;;  %v691_v4 = vld [vmem:[#allocation2 + $0x258] sm:$0xff] }
 0x13a   :  { %1432 = vmatpush3.bf16.msra.mxu1 %v1431_v6  ;;  %v570_v6 = vld [vmem:[#allocation4 + $0x178] sm:$0xff] }
 0x13b   :  { %1433 = vmatprep.subr.bf16.mxu1 %v1641_v0  ;;  %v1472_v8 = vpack.c.bf16 %v570_v6, %v568_v5  ;;  %v1508_v5 = vpack.c.bf16 %v691_v4, %v690_v3  ;;  %v692_v6 = vld [vmem:[#allocation2 + $0x260] sm:$0xff]  ;;  %v882_v3 = vld [vmem:[#allocation4 + $0x250] sm:$0xff]  ;;  %v885_v4 = vld [vmem:[#allocation4 + $0x268] sm:$0xff] }
 0x13e   :  { %1435 = vmatpush3.bf16.msra.mxu1 %v1434_v9  ;;  %v567_v9 = vld [vmem:[#allocation4 + $0x160] sm:$0xff] }
 0x1f4   :  { %v234_v50 = vpop.f32.mrb[0].mxu1 }
 0x1f5   :  { %v235_v51 = vadd.f32 %v1009_v49, %v234_v50  ;;  %v1191_v52 = vpop.f32.mrb[1].mxu1  ;;  %v1458_v49 = vpack.c.bf16 %v474_v48, %v473_v46  ;;  %v556_v50 = vld [vmem:[#allocation4 + $0x108] sm:$0xff]  ;;  %v682_v46 = vld [vmem:[#allocation2 + $0x210] sm:$0xff] }
 0x1f6   :  { %v555_v52 = vld [vmem:[#allocation4 + $0x100] sm:$0xff] }
 0x1f7   :  { %v238_v53 = vmax.f32 %v235_v51, 0.0  ;;  %v558_v51 = vld [vmem:[#allocation4 + $0x118] sm:$0xff]  ;;  %v1462_v57 = vpack.c.bf16 %v557_v54, %v555_v52 }
 0x1f9   :  { %348 = vmatmul.mubr.f32.vlgmr.msra.gmra.mrb[2].mxu0 %v238_v53  ;;  %v1460_v53 = vpack.c.bf16 %v558_v51, %v556_v50  ;;  %v1013_v51 = vld [vmem:[%s1820_s2 + $0x3] ss:$0 sm:$0xff] }
 0x1fa   :  { %1259 = vmatprep.mubr.msk.f32.mxu0 %vm1642_vm0, %v1643_v1  ;;  %1438 = vmatpush3.bf16.msra.mxu0 %v1437_v28 }
 0x1fb   :  { %1439 = vmatprep.subr.bf16.mxu0 %v1641_v0  ;;  %1461 = vmatprep.subr.bf16.mxu1 %v1460_v53 }
 0x1fe   :  { %1441 = vmatpush3.bf16.msra.mxu0 %v1440_v31  ;;  %v579_v31 = vld [vmem:[#allocation4 + $0x1c0] sm:$0xff] }
 0x1ff   :  { %1442 = vmatprep.subr.bf16.mxu0 %v1641_v0  ;;  %v1486_v33 = vpack.c.bf16 %v581_v32, %v579_v31  ;;  %v1517_v31 = vpack.c.bf16 %v777_v27, %v776_v26  ;;  %v779_v32 = vld [vmem:[#allocation2 + $0x298] sm:$0xff] }
 0x200   :  { %v899_v26 = vld [vmem:[#allocation4 + $0x2d8] sm:$0xff] }
 0x202   :  { %1444 = vmatpush3.bf16.msra.mxu0 %v1443_v34  ;;  %v1011_v34 = vld [vmem:[%s1820_s2 + $0x2] ss:$0 sm:$0xff] }
 0x203   :  { %1445 = vmatprep.subr.bf16.mxu0 %v1641_v0 }
 0x2cc   :  { %v349_v15 = vpop.f32.mrb[2].mxu0 }
 0x2cd   :  { %v351_v16 = vpop.f32.mrb[3].mxu0  ;;  %v350_v23 = vadd.f32 %v349_v15, %v276_v21  ;;  %v1474_v15 = vpack.c.bf16 %v569_v11, %v567_v9  ;;  %v578_v21 = vld [vmem:[#allocation4 + $0x1b8] sm:$0xff]  ;;  %v694_v9 = vld [vmem:[#allocation2 + $0x270] sm:$0xff] }
 0x2ce   :  { %v352_v17 = vadd.f32 %v351_v16, %v280_v14  ;;  %v574_v14 = vld [vmem:[#allocation4 + $0x198] sm:$0xff] }
 0x2cf   :  { %v1476_v16 = vpack.c.bf16 %v574_v14, %v572_v13  ;;  %v695_v11 = vld [vmem:[#allocation2 + $0x278] sm:$0xff] }
 0x2d0   :  { %v354_v18 = vmax.f32 %v352_v17, -11.512925  ;;  %v571_v17 = vld [vmem:[#allocation4 + $0x180] sm:$0xff]  ;;  %v1514_v13 = vpack.c.bf16 %v695_v11, %v694_v9  ;;  %v1014_v14 = vld [vmem:[%s1822_s4 + $0x2] sm:$0x3]  ;;  %v886_v9 = vld [vmem:[#allocation4 + $0x270] sm:$0xff] }
 0x2d1   :  { %v889_v11 = vld [vmem:[#allocation4 + $0x288] sm:$0xff] }
 0x2d2   :  { %v355_v19 = vmul.f32 1.442695, %v354_v18  ;;  %359 = vadd.xlane.f32.xlu0 %v354_v18  ;;  %v573_v18 = vld [vmem:[#allocation4 + $0x190] sm:$0xff] }
 0x2d4   :  { %1581 = vpow2.f32 %v355_v19  ;;  %v576_v19 = vld [vmem:[#allocation4 + $0x1a8] sm:$0xff] }
 0x2de   :  { %v1582_v22 = vpop.eup %1581 }
 0x2df   :  { %v357_v24 = vmul.f32 %v1582_v22, %v1720_v47  ;;  %v465_v47 = vld [vmem:[#allocation2 + $0x1b0] sm:$0xff]  ;;  %v1478_v22 = vpack.c.bf16 %v573_v18, %v571_v17 }
 0x2e0   :  { %v1446_v36 = vpack.c.bf16 %v466_v35, %v465_v47 }
 0x2e1   :  { %v1755_v30 = vadd.f32 %v357_v24, %v350_v23  ;;  %v1480_v23 = vpack.c.bf16 %v578_v21, %v576_v19  ;;  %v575_v24 = vld [vmem:[#allocation4 + $0x1a0] sm:$0xff] }
 0x2e2   :  { %1447 = vmatpush3.bf16.msra.mxu0 %v1446_v36  ;;  %v1482_v28 = vpack.c.bf16 %v577_v25, %v575_v24 }
 0x2e3   :  { %1225 = vmatmul.mubr.f32.vlgmr.msra.gmra.mrb[2].mxu1 %v1755_v30  ;;  %1448 = vmatprep.subr.bf16.mxu0 %v1641_v0 }
 0x2e4   :  { %664 = vmatprep.mubr.f32.mxu1 %v1643_v1  ;;  %1463 = vmatpush1.bf16.msra.mxu1 %v1462_v57  ;;  %v685_v57 = vld [vmem:[#allocation2 + $0x228] sm:$0xff] }
 0x2e5   :  { %1465 = vmatprep.subr.bf16.mxu1 %v1464_v58  ;;  %v1499_v58 = vpack.c.bf16 %v685_v57, %v684_v56  ;;  %v879_v56 = vld [vmem:[#allocation4 + $0x238] sm:$0xff] }
 0x2e6   :  { %1450 = vmatpush3.bf16.msra.mxu0 %v1449_v39  ;;  %v586_v39 = vld [vmem:[#allocation4 + $0x1f8] sm:$0xff] }
 0x2e7   :  { %1451 = vmatprep.subr.bf16.mxu0 %v1641_v0  ;;  %v1488_v40 = vpack.c.bf16 %v586_v39, %v584_v38  ;;  %v784_v38 = vld [vmem:[#allocation2 + $0x2c0] sm:$0xff]  ;;  %v785_v39 = vld [vmem:[#allocation2 + $0x2c8] sm:$0xff] }
 0x2e8   :  { %1467 = vmatpush1.bf16.msra.mxu1 %v1466_v63  ;;  %v689_v63 = vld [vmem:[#allocation2 + $0x248] sm:$0xff] }
 0x2e9   :  { %1469 = vmatprep.subr.bf16.mxu1 %v1468_v2  ;;  %v1505_v2 = vpack.c.bf16 %v689_v63, %v688_v62  ;;  %v883_v62 = vld [vmem:[#allocation4 + $0x258] sm:$0xff] }
 0x2ea   :  { %1453 = vmatpush3.bf16.msra.mxu0 %v1452_v42  ;;  %v585_v42 = vld [vmem:[#allocation4 + $0x1f0] sm:$0xff] }
 0x2eb   :  { %1454 = vmatprep.subr.bf16.mxu0 %v1641_v0  ;;  %v1490_v43 = vpack.c.bf16 %v585_v42, %v583_v41  ;;  %v786_v41 = vld [vmem:[#allocation2 + $0x2d0] sm:$0xff]  ;;  %v787_v42 = vld [vmem:[#allocation2 + $0x2d8] sm:$0xff] }
 0x2ec   :  { %1471 = vmatpush1.bf16.msra.mxu1 %v1470_v7  ;;  %v693_v7 = vld [vmem:[#allocation2 + $0x268] sm:$0xff] }
 0x2ed   :  { %1473 = vmatprep.subr.bf16.mxu1 %v1472_v8  ;;  %v1511_v8 = vpack.c.bf16 %v693_v7, %v692_v6 }
 0x2ee   :  { %1456 = vmatpush3.bf16.msra.mxu0 %v1455_v45  ;;  %v681_v45 = vld [vmem:[#allocation2 + $0x208] sm:$0xff] }
 0x2ef   :  { %1457 = vmatprep.subr.bf16.mxu0 %v1641_v0  ;;  %v1493_v48 = vpack.c.bf16 %v681_v45, %v680_v44  ;;  %v789_v44 = vld [vmem:[#allocation2 + $0x2e8] sm:$0xff] }
 0x2f0   :  { %1475 = vmatpush1.bf16.msra.mxu1 %v1474_v15  ;;  %v597_v15 = vrot.slane %v1014_v14, %v1745_v12 }
 0x2f1   :  { %1477 = vmatprep.subr.bf16.mxu1 %v1476_v16 }
 0x2f2   :  { %1459 = vmatpush3.bf16.msra.mxu0 %v1458_v49  ;;  %v683_v49 = vld [vmem:[#allocation2 + $0x218] sm:$0xff] }
 0x2f3   :  { %1492 = vmatprep.subr.bf16.mxu0 %v1641_v0  ;;  %v1496_v50 = vpack.c.bf16 %v683_v49, %v682_v46  ;;  %v790_v46 = vld [vmem:[#allocation2 + $0x2f0] sm:$0xff] }
 0x2f4   :  { %1479 = vmatpush1.bf16.msra.mxu1 %v1478_v22  ;;  %v593_v22 = vrot.slane %v1014_v14, %v1751_v20 }
 0x2f5   :  { %1481 = vmatprep.subr.bf16.mxu1 %v1480_v23 }
 0x2f8   :  { %1483 = vmatpush1.bf16.msra.mxu1 %v1482_v28  ;;  %v778_v28 = vld [vmem:[#allocation2 + $0x290] sm:$0xff] }
 0x2f9   :  { %1485 = vmatprep.subr.bf16.mxu1 %v1484_v29 }
 0x2fc   :  { %1487 = vmatpush1.bf16.msra.mxu1 %v1486_v33  ;;  %v1520_v33 = vpack.c.bf16 %v779_v32, %v778_v28  ;;  %v898_v32 = vld [vmem:[#allocation4 + $0x2d0] sm:$0xff] }
 0x2fd   :  { %1489 = vmatprep.subr.bf16.mxu1 %v1488_v40  ;;  %v1529_v40 = vpack.c.bf16 %v785_v39, %v784_v38  ;;  %v903_v38 = vld [vmem:[#allocation4 + $0x2f8] sm:$0xff] }
 0x300   :  { %1491 = vmatpush1.bf16.msra.mxu1 %v1490_v43  ;;  %v788_v43 = vld [vmem:[#allocation2 + $0x2e0] sm:$0xff] }
 0x301   :  { %1516 = vmatprep.subr.bf16.mxu1 %v1641_v0  ;;  %v1535_v45 = vpack.c.bf16 %v789_v44, %v788_v43 }
 0x3b6   :  { %v453_v47 = vpop.f32.mrb[2].mxu1 }
 0x3b7   :  { %v454_v35 = vadd.f32 %v1011_v34, %v453_v47  ;;  %v1226_v36 = vpop.f32.mrb[3].mxu1  ;;  %v780_v34 = vld [vmem:[#allocation2 + $0x2a0] sm:$0xff]  ;;  %v781_v47 = vld [vmem:[#allocation2 + $0x2a8] sm:$0xff] }
 0x3b8   :  { %v783_v36 = vld [vmem:[#allocation2 + $0x2b8] sm:$0xff] }
 0x3b9   :  { %v457_v37 = vmax.f32 %v454_v35, 0.0  ;;  %v1523_v35 = vpack.c.bf16 %v781_v47, %v780_v34  ;;  %v1016_v34 = vld [vmem:[%s1820_s2 + $0x4] ss:$0 sm:$0xff] }
 0x3bb   :  { %1260 = vmatmul.mubr.f32.vlgmr.msra.gmra.mrb[4].mxu0 %v457_v37 }
 0x3bc   :  { %1294 = vmatprep.mubr.msk.f32.mxu0 %vm1642_vm0, %v1643_v1  ;;  %1494 = vmatpush3.bf16.msra.mxu0 %v1493_v48  ;;  %v791_v48 = vld [vmem:[#allocation2 + $0x2f8] sm:$0xff] }
 0x3bd   :  { %1495 = vmatprep.subr.bf16.mxu0 %v1641_v0  ;;  %v1538_v49 = vpack.c.bf16 %v791_v48, %v790_v46  ;;  %v1019_v48 = vld [vmem:[%s1822_s4 + $0x4] sm:$0x3] }
 0x3c0   :  { %1497 = vmatpush3.bf16.msra.mxu0 %v1496_v50  ;;  %v873_v50 = vld [vmem:[#allocation4 + $0x208] sm:$0xff] }
 0x3c1   :  { %1498 = vmatprep.subr.bf16.mxu0 %v1641_v0 }
 0x3c4   :  { %1500 = vmatpush3.bf16.msra.mxu0 %v1499_v58 }
 0x3c5   :  { %1501 = vmatprep.subr.bf16.mxu0 %v1641_v0 }
 0x3c8   :  { %1503 = vmatpush3.bf16.msra.mxu0 %v1502_v61  ;;  %v881_v61 = vld [vmem:[#allocation4 + $0x248] sm:$0xff] }
 0x3c9   :  { %1504 = vmatprep.subr.bf16.mxu0 %v1641_v0  ;;  %v1548_v63 = vpack.c.bf16 %v883_v62, %v881_v61  ;;  %v997_v62 = vand.u32 127, %v273_v10 }
 0x3cb   :  { %vm998_vm1 = vcmp.eq.s32.totalorder %v997_v62, 16 }
 0x3cc   :  { %1506 = vmatpush3.bf16.msra.mxu0 %v1505_v2  ;;  %v880_v2 = vld [vmem:[#allocation4 + $0x240] sm:$0xff] }
 0x3cd   :  { %1507 = vmatprep.subr.bf16.mxu0 %v1641_v0  ;;  %v1550_v6 = vpack.c.bf16 %v882_v3, %v880_v2 }
 0x3d0   :  { %1509 = vmatpush3.bf16.msra.mxu0 %v1508_v5  ;;  %v887_v5 = vld [vmem:[#allocation4 + $0x278] sm:$0xff] }
 0x3d1   :  { %1510 = vmatprep.subr.bf16.mxu0 %v1641_v0  ;;  %v1552_v7 = vpack.c.bf16 %v887_v5, %v885_v4 }
 0x3d4   :  { %1512 = vmatpush3.bf16.msra.mxu0 %v1511_v8  ;;  %v884_v8 = vld [vmem:[#allocation4 + $0x260] sm:$0xff] }
 0x3d5   :  { %1513 = vmatprep.subr.bf16.mxu0 %v1641_v0  ;;  %v1554_v14 = vpack.c.bf16 %v886_v9, %v884_v8 }
 0x3d8   :  { %1515 = vmatpush3.bf16.msra.mxu0 %v1514_v13  ;;  %v891_v13 = vld [vmem:[#allocation4 + $0x298] sm:$0xff] }
 0x48e   :  { %v549_v52 = vpop.f32.mrb[4].mxu0 }
 0x48f   :  { %v550_v53 = vadd.f32 %v1013_v51, %v549_v52  ;;  %v1261_v54 = vpop.f32.mrb[5].mxu0  ;;  %v875_v51 = vld [vmem:[#allocation4 + $0x218] sm:$0xff]  ;;  %v872_v52 = vld [vmem:[#allocation4 + $0x200] sm:$0xff] }
 0x490   :  { %v874_v54 = vld [vmem:[#allocation4 + $0x210] sm:$0xff] }
 0x491   :  { %v553_v55 = vmax.f32 %v550_v53, 0.0  ;;  %v1540_v53 = vpack.c.bf16 %v875_v51, %v873_v50  ;;  %v1542_v57 = vpack.c.bf16 %v874_v54, %v872_v52 }
 0x493   :  { %665 = vmatmul.mubr.f32.vlgmr.msra.gmra.mrb[4].mxu1 %v553_v55  ;;  %v877_v55 = vld [vmem:[#allocation4 + $0x228] sm:$0xff]  ;;  %1541 = vmatprep.subr.bf16.mxu0 %v1540_v53 }
 0x494   :  { %1329 = vmatprep.mubr.msk.f32.mxu1 %vm1642_vm0, %v1643_v1  ;;  %1518 = vmatpush3.bf16.msra.mxu1 %v1517_v31  ;;  %v1544_v58 = vpack.c.bf16 %v879_v56, %v877_v55  ;;  %v896_v31 = vld [vmem:[#allocation4 + $0x2c0] sm:$0xff]  ;;  %v910_v55 = vrot.slane %v1019_v48, %v1751_v20 }
 0x495   :  { %1519 = vmatprep.subr.bf16.mxu1 %v1641_v0 }
 0x498   :  { %1521 = vmatpush3.bf16.msra.mxu1 %v1520_v33  ;;  %v1566_v33 = vpack.c.bf16 %v898_v32, %v896_v31 }
 0x499   :  { %1522 = vmatprep.subr.bf16.mxu1 %v1641_v0 }
 0x49c   :  { %1524 = vmatpush3.bf16.msra.mxu1 %v1523_v35 }
 0x49d   :  { %1525 = vmatprep.subr.bf16.mxu1 %v1641_v0 }
 0x566   :  { %v666_v16 = vpop.f32.mrb[4].mxu1 }
 0x567   :  { %v668_v17 = vpop.f32.mrb[5].mxu1  ;;  %v667_v24 = vadd.f32 %v666_v16, %v593_v22  ;;  %v888_v16 = vld [vmem:[#allocation4 + $0x280] sm:$0xff] }
 0x568   :  { %v669_v18 = vadd.f32 %v668_v17, %v597_v15  ;;  %v1556_v15 = vpack.c.bf16 %v891_v13, %v889_v11  ;;  %v890_v17 = vld [vmem:[#allocation4 + $0x290] sm:$0xff] }
 0x56a   :  { %v671_v19 = vmax.f32 %v669_v18, -11.512925  ;;  %v893_v18 = vld [vmem:[#allocation4 + $0x2a8] sm:$0xff] }
 0x56c   :  { %v672_v21 = vmul.f32 1.442695, %v671_v19  ;;  %676 = vadd.xlane.f32.xlu0 %v671_v19  ;;  %v895_v19 = vld [vmem:[#allocation4 + $0x2b8] sm:$0xff] }
 0x56d   :  { %v1560_v22 = vpack.c.bf16 %v895_v19, %v893_v18 }
 0x56e   :  { %1583 = vpow2.f32 %v672_v21  ;;  %v1558_v21 = vpack.c.bf16 %v890_v17, %v888_v16 }
 0x578   :  { %v1584_v23 = vpop.eup %1583 }
 0x579   :  { %v674_v25 = vmul.f32 %v1584_v23, %v1755_v30  ;;  %v782_v30 = vld [vmem:[#allocation2 + $0x2b0] sm:$0xff]  ;;  %v892_v23 = vld [vmem:[#allocation4 + $0x2a0] sm:$0xff] }
 0x57a   :  { %v1526_v37 = vpack.c.bf16 %v783_v36, %v782_v30 }
 0x57b   :  { %v1791_v29 = vadd.f32 %v674_v25, %v667_v24  ;;  %v894_v24 = vld [vmem:[#allocation4 + $0x2b0] sm:$0xff]  ;;  %v897_v25 = vld [vmem:[#allocation4 + $0x2c8] sm:$0xff] }
 0x57c   :  { %1527 = vmatpush3.bf16.msra.mxu1 %v1526_v37  ;;  %v1562_v27 = vpack.c.bf16 %v894_v24, %v892_v23  ;;  %v1564_v28 = vpack.c.bf16 %v899_v26, %v897_v25  ;;  %v901_v37 = vld [vmem:[#allocation4 + $0x2e8] sm:$0xff] }
 0x57d   :  { %1295 = vmatmul.mubr.f32.vlgmr.msra.gmra.mrb[6].mxu0 %v1791_v29  ;;  %1528 = vmatprep.subr.bf16.mxu1 %v1641_v0  ;;  %v1568_v39 = vpack.c.bf16 %v903_v38, %v901_v37 }
 0x57e   :  { %981 = vmatprep.mubr.f32.mxu0 %v1643_v1  ;;  %v1532_v1 = vpack.c.bf16 %v787_v42, %v786_v41  ;;  %1543 = vmatpush1.bf16.msra.mxu0 %v1542_v57  ;;  %v902_v41 = vld [vmem:[#allocation4 + $0x2f0] sm:$0xff] }
 0x57f   :  { %1545 = vmatprep.subr.bf16.mxu0 %v1544_v58 }
 0x580   :  { %1530 = vmatpush3.bf16.msra.mxu1 %v1529_v40  ;;  %v900_v40 = vld [vmem:[#allocation4 + $0x2e0] sm:$0xff] }
 0x581   :  { %1531 = vmatprep.subr.bf16.mxu1 %v1641_v0  ;;  %v1570_v42 = vpack.c.bf16 %v902_v41, %v900_v40 }
 0x584   :  { %1533 = vmatpush3.bf16.msra.mxu1 %v1532_v1  ;;  %v1018_v1 = vld [vmem:[%s1820_s2 + $0x5] ss:$0 sm:$0xff] }
 0x585   :  { %1534 = vmatprep.subr.bf16.mxu1 %v1641_v0 }
 0x588   :  { %1536 = vmatpush3.bf16.msra.mxu1 %v1535_v45 }
 0x589   :  { %1537 = vmatprep.subr.bf16.mxu1 %v1641_v0  ;;  %v1546_v0 = vpack.c.bf16 %v878_v60, %v876_v59  ;;  %v360_v60 = vpop.xlane.xlu0 %359 }
 0x58b   :  { %1547 = vmatpush1.bf16.msra.mxu0 %v1546_v0 }
 0x58c   :  { %1539 = vmatpush3.bf16.msra.mxu1 %v1538_v49  ;;  %1549 = vmatprep.subr.bf16.mxu0 %v1548_v63  ;;  %v914_v49 = vrot.slane %v1019_v48, %v1745_v12 }
 0x58f   :  { %1551 = vmatpush1.bf16.msra.mxu0 %v1550_v6 }
 0x590   :  { %1553 = vmatprep.subr.bf16.mxu0 %v1552_v7 }
 0x593   :  { %1555 = vmatpush1.bf16.msra.mxu0 %v1554_v14 }
 0x594   :  { %1557 = vmatprep.subr.bf16.mxu0 %v1556_v15 }
 0x597   :  { %1559 = vmatpush1.bf16.msra.mxu0 %v1558_v21 }
 0x598   :  { %1561 = vmatprep.subr.bf16.mxu0 %v1560_v22 }
 0x59b   :  { %1563 = vmatpush1.bf16.msra.mxu0 %v1562_v27 }
 0x59c   :  { %1565 = vmatprep.subr.bf16.mxu0 %v1564_v28 }
 0x59f   :  { %1567 = vmatpush1.bf16.msra.mxu0 %v1566_v33 }
 0x5a0   :  { %1569 = vmatprep.subr.bf16.mxu0 %v1568_v39 }
 0x5a3   :  { %1571 = vmatpush1.bf16.msra.mxu0 %v1570_v42 }
 0x5f9   :  { %v677_v61 = vpop.xlane.xlu0 %676 }
 0x5fa   :  { %v678_v0 = vadd.f32 %v677_v61, %v360_v60 }
 0x650   :  { %v770_v47 = vpop.f32.mrb[6].mxu0 }
 0x651   :  { %v771_v35 = vadd.f32 %v1016_v34, %v770_v47  ;;  %v1296_v30 = vpop.f32.mrb[7].mxu0 }
 0x653   :  { %v774_v36 = vmax.f32 %v771_v35, 0.0 }
 0x655   :  { %1330 = vmatmul.mubr.f32.vlgmr.msra.gmra.mrb[6].mxu1 %v774_v36 }
 0x728   :  { %v866_v43 = vpop.f32.mrb[6].mxu1 }
 0x729   :  { %v867_v44 = vadd.f32 %v1018_v1, %v866_v43  ;;  %v1331_v45 = vpop.f32.mrb[7].mxu1 }
 0x72b   :  { %v870_v46 = vmax.f32 %v867_v44, 0.0 }
 0x72d   :  { %982 = vmatmul.mubr.f32.vlgmr.msra.gmra.mrb[8].mxu0 %v870_v46 }
 0x800   :  { %v983_v50 = vpop.f32.mrb[8].mxu0 }
 0x801   :  { %v985_v51 = vpop.f32.mrb[9].mxu0  ;;  %v984_v57 = vadd.f32 %v983_v50, %v910_v55 }
 0x802   :  { %v986_v52 = vadd.f32 %v985_v51, %v914_v49 }
 0x804   :  { %v988_v53 = vmax.f32 %v986_v52, -11.512925 }
 0x806   :  { %v989_v54 = vmul.f32 1.442695, %v988_v53  ;;  %993 = vadd.xlane.f32.xlu1 %v988_v53 }
 0x808   :  { %1585 = vpow2.f32 %v989_v54 }
 0x812   :  { %v1586_v56 = vpop.eup %1585 }
 0x813   :  { %v991_v58 = vmul.f32 %v1586_v56, %v1791_v29 }
 0x815   :  { %v992_v59 = vadd.f32 %v991_v58, %v984_v57 }
 0x893   :  { %v994_v12 = vpop.xlane.xlu1 %993 }
 0x894   :  { %v995_v63 = vadd.f32 %v994_v12, %v678_v0 }
 0x896   :  { %v999_v2 = vsel %vm998_vm1, %v995_v63, %v992_v59 }
 0x897   :  { %1000 = vst [vmem:[%s1823_s5] sm:$0xff] %v999_v2 }
 0x898   :  { %1005 = vsyncpa [#allocation3], 1 }
 0x899   :  { %1006 = vsyncpa [#allocation5], 1 }

</bundles_post_ra>
